<compile_context>
chip_gen: v6e
topology: v6e:2x2x1
jax: 0.10.0
libtpu: 0.0.40
codegen_flags: <defaults>
</compile_context>

<pallas_src>
import math
from functools import partial

import numpy as np
import jax
import jax.numpy as jnp
from jax.experimental import pallas as pl
from jax.experimental.pallas import tpu as pltpu

LN_EPS = 1e-5
MAX_TILE_LINEAR = 256            # voxel-tile cap for the fused Linear+LN+ReLU kernel
MAX_TILE_ATTN = 128              # voxel-tile cap for the fused SubMAttention3d kernel
VMEM_LIMIT_BYTES = 48 * 1024 * 1024   # fits v5e/v6e (128 MiB phys) and v7x (64 MiB phys)


def _round_up(v, m):
    return (int(v) + m - 1) // m * m


def _choose_tile(n, max_tile):
    """Largest allowed voxel tile (multiple of 8) that still leaves >=2 grid steps when
    possible, so the 'parallel' grid axis can shard across v7x's two TensorCores."""
    npad = _round_up(max(int(n), 1), 8)
    if npad <= 8:
        return 8
    half = _round_up((npad + 1) // 2, 8)
    return int(min(max_tile, half))


# ----------------------------------------------------------------------------
# Pallas kernels
# ----------------------------------------------------------------------------
def _linear_ln_act_kernel(x_ref, w_ref, b_ref, g_ref, beta_ref, o_ref, *, relu):
    """y = ReLU(LayerNorm(x @ W + b)) for a tile of voxels.  W is bf16, accum f32."""
    x = x_ref[...]
    y = jnp.dot(x.astype(jnp.bfloat16), w_ref[...],
                preferred_element_type=jnp.float32) + b_ref[...]
    mu = jnp.mean(y, axis=-1, keepdims=True)
    var = jnp.mean((y - mu) ** 2, axis=-1, keepdims=True)
    y = (y - mu) * jax.lax.rsqrt(var + LN_EPS)
    y = y * g_ref[...] + beta_ref[...]
    if relu:
        y = jnp.maximum(y, 0.0)
    o_ref[...] = y


def _subm_attn_kernel(x_ref, keys_ref, rel_ref, mask_ref,
                      wp_ref, bp_ref,
                      wq_ref, bq_ref, wk_ref, bk_ref, wv_ref, bv_ref,
                      wo_ref, bo_ref,
                      g1_ref, be1_ref, w1_ref, b1_ref, w2_ref, b2_ref,
                      g2_ref, be2_ref, o_ref, *, num_heads):
    """Full SubMAttention3d block for a tile of voxels:
       pos-emb Conv1d(3->C)+ReLU, MHA with key_padding_mask, residual, LN, FFN, residual, LN.
       qk_scale and the softmax 1/sqrt(d) scale are pre-folded into wq/bq/wk on the host."""
    x = x_ref[...]                         # (T, C)     f32
    keys2 = keys_ref[...]                  # (T*K, C)   f32 (pre-flattened)
    rel2 = rel_ref[...]                    # (T*K, 3)   f32 (pre-flattened)
    mask = mask_ref[...]                   # (T, K)     f32, 1.0 == masked
    T, C = x.shape
    K = mask.shape[1]

    # key positional embedding (Conv1d(3, C, 1) + ReLU, channels-last here)
    pos = jnp.dot(rel2.astype(jnp.bfloat16), wp_ref[...],
                  preferred_element_type=jnp.float32) + bp_ref[...]
    pos = jnp.maximum(pos, 0.0)            # (T*K, C)
    keyf2 = keys2 + pos                    # key_features + pos_emb, f32
    keyf_bf = keyf2.astype(jnp.bfloat16)
    x_bf = x.astype(jnp.bfloat16)

    # projections (scales already folded into wq/bq/wk on the host)
    q = jnp.dot(x_bf, wq_ref[...], preferred_element_type=jnp.float32) + bq_ref[...]      # (T, C)
    k2 = jnp.dot(keyf_bf, wk_ref[...], preferred_element_type=jnp.float32) + bk_ref[...]  # (T*K, C)
    v2 = jnp.dot(keyf_bf, wv_ref[...], preferred_element_type=jnp.float32) + bv_ref[...]  # (T*K, C)
    k = k2.reshape(T, K, C)
    v = v2.reshape(T, K, C)

    # key_padding_mask -> additive bias, hoisted out of the head loop
    neg_bias = jnp.where(mask > 0.5, jnp.float32(-1e30), jnp.float32(0.0))   # (T, K)

    d = C // num_heads
    head_outs = []
    for h in range(num_heads):
        qh = q[:, h * d:(h + 1) * d]                 # (T, d)
        kh = k[:, :, h * d:(h + 1) * d]              # (T, K, d)
        vh = v[:, :, h * d:(h + 1) * d]              # (T, K, d)
        logits = jnp.sum(qh[:, None, :] * kh, axis=-1) + neg_bias     # (T, K)
        m = jnp.max(logits, axis=-1, keepdims=True)
        e = jnp.exp(logits - m)
        p = e / jnp.sum(e, axis=-1, keepdims=True)
        head_outs.append(jnp.sum(p[:, :, None] * vh, axis=1))         # (T, d)
    attn = jnp.concatenate(head_outs, axis=-1)                        # (T, C)
    attn = jnp.dot(attn.astype(jnp.bfloat16), wo_ref[...],
                   preferred_element_type=jnp.float32) + bo_ref[...]

    def layernorm(z, g, b):
        mu = jnp.mean(z, axis=-1, keepdims=True)
        var = jnp.mean((z - mu) ** 2, axis=-1, keepdims=True)
        return (z - mu) * jax.lax.rsqrt(var + LN_EPS) * g + b

    x1 = layernorm(x + attn, g1_ref[...], be1_ref[...])
    ff = jnp.dot(x1.astype(jnp.bfloat16), w1_ref[...],
                 preferred_element_type=jnp.float32) + b1_ref[...]
    ff = jnp.maximum(ff, 0.0)
    ff = jnp.dot(ff.astype(jnp.bfloat16), w2_ref[...],
                 preferred_element_type=jnp.float32) + b2_ref[...]
    o_ref[...] = layernorm(x1 + ff, g2_ref[...], be2_ref[...])


# ----------------------------------------------------------------------------
# Pallas wrappers
# ----------------------------------------------------------------------------
def _pad_rows(a, npad):
    pad = npad - a.shape[0]
    if pad == 0:
        return a
    return jnp.concatenate([a, jnp.zeros((pad,) + a.shape[1:], a.dtype)], axis=0)


def linear_ln_relu(x, w, b, gamma, beta):
    """Pallas: (N, Cin) -> (N, Cout) : Linear + LayerNorm + ReLU."""
    n, cin = x.shape
    cout = w.shape[1]
    tile = _choose_tile(n, MAX_TILE_LINEAR)
    npad = _round_up(n, tile)
    xp = _pad_rows(x.astype(jnp.float32), npad)
    wb = w.astype(jnp.bfloat16)
    out = pl.pallas_call(
        partial(_linear_ln_act_kernel, relu=True),
        out_shape=jax.ShapeDtypeStruct((npad, cout), jnp.float32),
        grid=(npad // tile,),
        in_specs=[
            pl.BlockSpec((tile, cin), lambda i: (i, 0)),
            pl.BlockSpec((cin, cout), lambda i: (0, 0)),
            pl.BlockSpec((1, cout), lambda i: (0, 0)),
            pl.BlockSpec((1, cout), lambda i: (0, 0)),
            pl.BlockSpec((1, cout), lambda i: (0, 0)),
        ],
        out_specs=pl.BlockSpec((tile, cout), lambda i: (i, 0)),
        compiler_params=pltpu.CompilerParams(
            dimension_semantics=("parallel",),
            vmem_limit_bytes=VMEM_LIMIT_BYTES),
    )(xp, wb, b.reshape(1, cout), gamma.reshape(1, cout), beta.reshape(1, cout))
    return out[:n]


def subm_attention_pallas(x, keys, rel, maskf, p, num_heads, qk_scale):
    """Pallas: one SubMAttention3d block over all voxels.

    x: (N, C); keys: (N, K, C); rel: (N, K, 3); maskf: (N, K) with 1.0 == masked key."""
    n, C = x.shape
    K = keys.shape[1]
    FF = p['w1'].shape[1]
    d = C // num_heads
    sm_scale = 1.0 / math.sqrt(d)

    tile = _choose_tile(n, MAX_TILE_ATTN)
    npad = _round_up(n, tile)
    xp = _pad_rows(x.astype(jnp.float32), npad)
    keysp = _pad_rows(keys.astype(jnp.float32), npad).reshape(npad * K, C)
    relp = _pad_rows(rel.astype(jnp.float32), npad).reshape(npad * K, 3)
    maskp = _pad_rows(maskf.astype(jnp.float32), npad)

    # Fold qk_scale (applied to BOTH q and k paths, exactly as the reference does with
    # query*scale / key*scale) and MultiheadAttention's 1/sqrt(d) into the weights.
    wq = (p['wq'] * (qk_scale * sm_scale)).astype(jnp.bfloat16)
    bq = (p['bq'] * sm_scale).reshape(1, C).astype(jnp.float32)
    wk = (p['wk'] * qk_scale).astype(jnp.bfloat16)
    bk = p['bk'].reshape(1, C)
    wv = p['wv'].astype(jnp.bfloat16)
    bv = p['bv'].reshape(1, C)
    wp_ = p['wp'].astype(jnp.bfloat16)
    wo = p['wo'].astype(jnp.bfloat16)
    w1 = p['w1'].astype(jnp.bfloat16)
    w2 = p['w2'].astype(jnp.bfloat16)

    full = lambda i: (0, 0)
    out = pl.pallas_call(
        partial(_subm_attn_kernel, num_heads=num_heads),
        out_shape=jax.ShapeDtypeStruct((npad, C), jnp.float32),
        grid=(npad // tile,),
        in_specs=[
            pl.BlockSpec((tile, C), lambda i: (i, 0)),        # x
            pl.BlockSpec((tile * K, C), lambda i: (i, 0)),    # keys (flattened)
            pl.BlockSpec((tile * K, 3), lambda i: (i, 0)),    # rel  (flattened)
            pl.BlockSpec((tile, K), lambda i: (i, 0)),        # mask
            pl.BlockSpec((3, C), full),                       # wp
            pl.BlockSpec((1, C), full),                       # bp
            pl.BlockSpec((C, C), full),                       # wq
            pl.BlockSpec((1, C), full),                       # bq
            pl.BlockSpec((C, C), full),                       # wk
            pl.BlockSpec((1, C), full),                       # bk
            pl.BlockSpec((C, C), full),                       # wv
            pl.BlockSpec((1, C), full),                       # bv
            pl.BlockSpec((C, C), full),                       # wo
            pl.BlockSpec((1, C), full),                       # bo
            pl.BlockSpec((1, C), full),                       # g1
            pl.BlockSpec((1, C), full),                       # be1
            pl.BlockSpec((C, FF), full),                      # w1
            pl.BlockSpec((1, FF), full),                      # b1
            pl.BlockSpec((FF, C), full),                      # w2
            pl.BlockSpec((1, C), full),                       # b2
            pl.BlockSpec((1, C), full),                       # g2
            pl.BlockSpec((1, C), full),                       # be2
        ],
        out_specs=pl.BlockSpec((tile, C), lambda i: (i, 0)),
        compiler_params=pltpu.CompilerParams(
            dimension_semantics=("parallel",),
            vmem_limit_bytes=VMEM_LIMIT_BYTES),
    )(xp, keysp, relp, maskp,
      wp_, p['bp'].reshape(1, C),
      wq, bq, wk, bk, wv, bv,
      wo, p['bo'].reshape(1, C),
      p['g1'].reshape(1, C), p['be1'].reshape(1, C),
      w1, p['b1'].reshape(1, FF), w2, p['b2'].reshape(1, C),
      p['g2'].reshape(1, C), p['be2'].reshape(1, C))
    return out[:n]


# ----------------------------------------------------------------------------
# Host-side sparse-index bookkeeping (emulates votr_utils @torch.no_grad ops)
# ----------------------------------------------------------------------------
def _voxel_map(indices):
    return {tuple(int(v) for v in row): i for i, row in enumerate(indices)}


def downsample_indices(indices, strides, num_ds_voxels, batch_size):
    """hash_table_down_sample: unique downsampled coords, first-occurrence order, per-batch cap."""
    sx, sy, sz = strides
    seen = {}
    counts = {b: 0 for b in range(batch_size)}
    out = []
    for b, z, y, x in indices:
        key = (int(b), int(z) // sz, int(y) // sy, int(x) // sx)
        if key not in seen and counts[int(b)] < num_ds_voxels:
            seen[key] = len(out)
            counts[int(b)] += 1
            out.append(list(key))
    return np.asarray(out, dtype=np.int32)


def sparse_local_attention_indices(orig_indices, new_indices, strides, attend_size):
    """sparse_local_attention_hash_indices: original voxels inside each downsampled cell."""
    sx, sy, sz = strides
    vmap = _voxel_map(orig_indices)
    M = new_indices.shape[0]
    key_idx = -np.ones((M, attend_size), dtype=np.int64)
    for m in range(M):
        b, nz, ny, nx = (int(v) for v in new_indices[m])
        cnt = 0
        for dz in range(sz):
            for dy in range(sy):
                for dx in range(sx):
                    if cnt >= attend_size:
                        break
                    key = (b, nz * sz + dz, ny * sy + dy, nx * sx + dx)
                    if key in vmap:
                        key_idx[m, cnt] = vmap[key]
                        cnt += 1
    return key_idx, key_idx < 0


def subm_local_attention_indices(indices, attend_size, attend_range):
    """subm_local_attention_hash_indices: same-resolution neighbors in a Chebyshev window (self first)."""
    vmap = _voxel_map(indices)
    N = indices.shape[0]
    offsets = sorted(
        [(dz, dy, dx)
         for dz in range(-attend_range, attend_range + 1)
         for dy in range(-attend_range, attend_range + 1)
         for dx in range(-attend_range, attend_range + 1)],
        key=lambda o: (max(abs(o[0]), abs(o[1]), abs(o[2])), o))
    key_idx = -np.ones((N, attend_size), dtype=np.int64)
    for n in range(N):
        b, z, y, x = (int(v) for v in indices[n])
        cnt = 0
        for dz, dy, dx in offsets:
            if cnt >= attend_size:
                break
            key = (b, z + dz, y + dy, x + dx)
            if key in vmap:
                key_idx[n, cnt] = vmap[key]
                cnt += 1
    return key_idx, key_idx < 0


def gather_rows(feat, key_idx):
    """grouping_operation (global-index emulation): (N, C), (M, K) -> (M, K, C).

    TODO(synk): this (N, K, C) key gather is still an XLA-level jnp.take outside the kernel;
                fusing it (scalar-prefetched indices + in-kernel gather) would cut HBM traffic
                ~K-fold, but a data-dependent per-row gather has no robust Pallas-TPU lowering
                at these shapes, so it stays on the XLA side."""
    n = feat.shape[0]
    clip = np.clip(key_idx, 0, n - 1).astype(np.int32)
    return jnp.take(feat, jnp.asarray(clip), axis=0)


# ----------------------------------------------------------------------------
# Model config & deterministic parameter init
# ----------------------------------------------------------------------------
CFG = {
    'grid_size': [16, 16, 8],                    # [X, Y, Z]
    'voxel_size': [0.1, 0.1, 0.2],
    'point_cloud_range': [0.0, -0.8, -1.0, 1.6, 0.8, 0.6],
    'input_channels': 4,
    'params': [
        {'down': {'channels': (16, 32), 'stride': (2, 2, 2), 'num_ds_voxels': 1000, 'attend_size': 8},
         'subm': {'num_blocks': 1, 'channels': (32, 64, 32), 'num_heads': 2,
                  'attend_size': 16, 'attend_range': 1, 'scale': 0}},
        {'down': {'channels': (32, 32), 'stride': (2, 2, 2), 'num_ds_voxels': 1000, 'attend_size': 8},
         'subm': {'num_blocks': 1, 'channels': (32, 64, 32), 'num_heads': 2,
                  'attend_size': 16, 'attend_range': 1, 'scale': 0}},
        {'down': {'channels': (32, 32), 'stride': (2, 2, 2), 'num_ds_voxels': 1000, 'attend_size': 8},
         'subm': {'num_blocks': 1, 'channels': (32, 64, 32), 'num_heads': 2,
                  'attend_size': 16, 'attend_range': 1, 'scale': 0}},
    ],
}


class _KeyGen:
    def __init__(self, key):
        self.key, self.i = key, 0

    def __call__(self):
        self.i += 1
        return jax.random.fold_in(self.key, self.i)


def _w(kg, shape, scale=0.1):
    return scale * jax.random.normal(kg(), shape, dtype=jnp.float32)


def init_params(key, cfg):
    kg = _KeyGen(key)
    params = {
        'in_w': _w(kg, (cfg['input_channels'], 16)),
        'in_b': _w(kg, (16,)),
        'in_g': jnp.ones((16,), jnp.float32),
        'in_beta': jnp.zeros((16,), jnp.float32),
        'blocks': [],
    }
    for bcfg in cfg['params']:
        cin, cout = bcfg['down']['channels']
        down = {
            'w': _w(kg, (cin * 8, cout)),
            'b0': jnp.zeros((cout,), jnp.float32),        # Linear(..., bias=False)
            'g': jnp.ones((cout,), jnp.float32),
            'beta': jnp.zeros((cout,), jnp.float32),
        }
        C, FF, _ = bcfg['subm']['channels']
        subms = []
        for _ in range(bcfg['subm']['num_blocks']):
            subms.append({
                'wp': _w(kg, (3, C)), 'bp': _w(kg, (C,)),
                'wq': _w(kg, (C, C)), 'bq': _w(kg, (C,)),
                'wk': _w(kg, (C, C)), 'bk': _w(kg, (C,)),
                'wv': _w(kg, (C, C)), 'bv': _w(kg, (C,)),
                'wo': _w(kg, (C, C)), 'bo': _w(kg, (C,)),
                'g1': jnp.ones((C,), jnp.float32), 'be1': jnp.zeros((C,), jnp.float32),
                'w1': _w(kg, (C, FF)), 'b1': _w(kg, (FF,)),
                'w2': _w(kg, (FF, C)), 'b2': _w(kg, (C,)),
                'g2': jnp.ones((C,), jnp.float32), 'be2': jnp.zeros((C,), jnp.float32),
            })
        params['blocks'].append({'down': down, 'subm': subms})
    return params


# ----------------------------------------------------------------------------
# Forward pass (glue + Pallas kernels)
# ----------------------------------------------------------------------------
def voxel_transformer_v3_forward(batch_dict, params, cfg):
    feats = batch_dict['voxel_features']          # (N, Cin) jnp
    indices = np.asarray(batch_dict['voxel_coords'], dtype=np.int32)   # (N, 4) [b, z, y, x]
    batch_size = batch_dict['batch_size']

    # input_transform -> input_norm(LN) -> ReLU   (Pallas kernel)
    x = linear_ln_relu(feats, params['in_w'], params['in_b'], params['in_g'], params['in_beta'])

    spatial_shape = list(cfg['grid_size'])
    voxel_size = list(cfg['voxel_size'])
    pcr = cfg['point_cloud_range']
    x_convs = [{'features': x, 'indices': indices}]

    for bi, bparams in enumerate(params['blocks']):
        bcfg = cfg['params'][bi]

        # ---------------- DownModule (down_type='reshape') ----------------
        strides = bcfg['down']['stride']
        new_indices = downsample_indices(indices, strides, bcfg['down']['num_ds_voxels'], batch_size)
        key_idx, key_mask = sparse_local_attention_indices(indices, new_indices, strides,
                                                           bcfg['down']['attend_size'])
        gathered = gather_rows(x, key_idx)                               # (M, 8, Cin)
        # TODO(synk): CUDA grouping with idx<0 is undefined; we deterministically zero-fill here.
        gathered = jnp.where(jnp.asarray(key_mask)[..., None], 0.0, gathered)
        M = gathered.shape[0]
        flat = gathered.reshape(M, -1)                                   # permute(0,2,1).view(M, 8*Cin)
        x = linear_ln_relu(flat, bparams['down']['w'], bparams['down']['b0'],
                           bparams['down']['g'], bparams['down']['beta'])
        spatial_shape = [spatial_shape[d] // strides[d] for d in range(3)]
        voxel_size = [voxel_size[d] * strides[d] for d in range(3)]
        indices = new_indices

        # ---------------- SubMAttention3d modules ----------------
        scfg = bcfg['subm']
        C = scfg['channels'][0]
        H = scfg['num_heads']
        qk_scale = float((C // H) ** (scfg['scale'] * 0.5))
        skey_idx, skey_mask = subm_local_attention_indices(indices, scfg['attend_size'],
                                                           scfg['attend_range'])
        coords_xyz = ((indices[:, [3, 2, 1]].astype(np.float32) + 0.5)
                      * np.asarray(voxel_size, np.float32)
                      + np.asarray(pcr[0:3], np.float32))                # with_coords
        clip = np.clip(skey_idx, 0, indices.shape[0] - 1)
        rel = coords_xyz[clip] - coords_xyz[:, None, :]                  # (N, K, 3)
        maskf = jnp.asarray(skey_mask.astype(np.float32))
        rel_j = jnp.asarray(rel)

        for sparams in bparams['subm']:
            keys = gather_rows(x, skey_idx)                              # (N, K, C)
            x = subm_attention_pallas(x, keys, rel_j, maskf, sparams, H, qk_scale)

        x_convs.append({'features': x, 'indices': indices})

    batch_dict['multi_scale_3d_features'] = {
        'x_conv1': x_convs[0], 'x_conv2': x_convs[1],
        'x_conv3': x_convs[2], 'x_conv4': x_convs[3],
    }
    batch_dict['encoded_spconv_tensor'] = {'features': x, 'indices': indices,
                                           'spatial_shape': spatial_shape,
                                           'voxel_size': voxel_size}
    batch_dict['encoded_spconv_tensor_stride'] = 8
    return batch_dict


# ----------------------------------------------------------------------------
# Demo
# ----------------------------------------------------------------------------
def make_inputs(key, batch_size, n_per_batch, grid_size, in_channels):
    X, Y, Z = grid_size
    rows = []
    for b in range(batch_size):
        perm = np.asarray(jax.random.permutation(jax.random.fold_in(key, 100 + b), X * Y * Z))
        cells = perm[:n_per_batch]
        xs = cells % X
        ys = (cells // X) % Y
        zs = cells // (X * Y)
        rows.append(np.stack([np.full_like(xs, b), zs, ys, xs], axis=1))
    coords = np.concatenate(rows, axis=0).astype(np.int32)            # (N, 4) [b, z, y, x]
    feats = jax.random.normal(jax.random.fold_in(key, 7), (coords.shape[0], in_channels),
                              dtype=jnp.float32)
    return feats, coords


if __name__ == "__main__":
    key = jax.random.PRNGKey(0)
    params = init_params(key, CFG)
    voxel_features, voxel_coords = make_inputs(key, batch_size=2, n_per_batch=48,
                                               grid_size=CFG['grid_size'],
                                               in_channels=CFG['input_channels'])
    batch_dict = {
        'voxel_features': voxel_features,     # (96, 4)
        'voxel_coords': voxel_coords,         # (96, 4) int [b, z, y, x]
        'batch_size': 2,
    }
    out = voxel_transformer_v3_forward(batch_dict, params, CFG)
    final = out['encoded_spconv_tensor']['features']
    jax.block_until_ready(final)
    for name in ['x_conv1', 'x_conv2', 'x_conv3', 'x_conv4']:
        jax.block_until_ready(out['multi_scale_3d_features'][name]['features'])
    assert bool(jnp.all(jnp.isfinite(final)))
    print("KERNEL_OK")
</pallas_src>

<mosaic_0001>
module attributes {stable_mosaic.version = 11 : i64} {
  func.func @_linear_ln_act_kernel(%arg0: i32, %arg1: memref<48x4xf32, #tpu.memory_space<vmem>>, %arg2: memref<4x16xbf16, #tpu.memory_space<vmem>>, %arg3: memref<1x16xf32, #tpu.memory_space<vmem>>, %arg4: memref<1x16xf32, #tpu.memory_space<vmem>>, %arg5: memref<1x16xf32, #tpu.memory_space<vmem>>, %arg6: memref<48x16xf32, #tpu.memory_space<vmem>>) attributes {dimension_semantics = [#tpu.dimension_semantics<parallel>], iteration_bounds = array<i64: 2>, scalar_prefetch = 0 : i64, scratch_operands = 0 : i64, tpu.core_type = #tpu.core_type<tc>, window_params = [{transform_indices = @transform_0, window_bounds = array<i64: 48, 4>}, {pipeline_mode = #tpu.pipeline_mode<synchronous>, transform_indices = @transform_1, window_bounds = array<i64: 4, 16>}, {pipeline_mode = #tpu.pipeline_mode<synchronous>, transform_indices = @transform_2, window_bounds = array<i64: 1, 16>}, {pipeline_mode = #tpu.pipeline_mode<synchronous>, transform_indices = @transform_3, window_bounds = array<i64: 1, 16>}, {pipeline_mode = #tpu.pipeline_mode<synchronous>, transform_indices = @transform_4, window_bounds = array<i64: 1, 16>}, {transform_indices = @transform_5, window_bounds = array<i64: 48, 16>}]} {
    %c0 = arith.constant 0 : index
    %c0_0 = arith.constant 0 : index
    %0 = vector.load %arg1[%c0, %c0_0] : memref<48x4xf32, #tpu.memory_space<vmem>>, vector<48x4xf32>
    %1 = arith.truncf %0 : vector<48x4xf32> to vector<48x4xbf16>
    %c0_1 = arith.constant 0 : index
    %c0_2 = arith.constant 0 : index
    %2 = vector.load %arg2[%c0_1, %c0_2] : memref<4x16xbf16, #tpu.memory_space<vmem>>, vector<4x16xbf16>
    %cst = arith.constant dense<0.000000e+00> : vector<48x16xf32>
    %3 = tpu.matmul %1, %2, %cst {dimension_numbers = #tpu.dot_dimension_numbers<[1], [0], [0], [1], [0, 0, 1, 1], [], []>} : vector<48x4xbf16>, vector<4x16xbf16>, vector<48x16xf32> -> vector<48x16xf32>
    %c0_3 = arith.constant 0 : index
    %c0_4 = arith.constant 0 : index
    %4 = vector.load %arg3[%c0_3, %c0_4] : memref<1x16xf32, #tpu.memory_space<vmem>>, vector<1x16xf32>
    %5 = vector.broadcast %4 : vector<1x16xf32> to vector<48x16xf32>
    %6 = arith.addf %3, %5 : vector<48x16xf32>
    %cst_5 = arith.constant dense<0.000000e+00> : vector<48xf32>
    %7 = vector.multi_reduction <add>, %6, %cst_5 [1] : vector<48x16xf32> to vector<48xf32>
    %8 = vector.shape_cast %7 : vector<48xf32> to vector<48x1xf32>
    %cst_6 = arith.constant 1.600000e+01 : f32
    %9 = vector.broadcast %cst_6 : f32 to vector<48x1xf32>
    %10 = arith.divf %8, %9 : vector<48x1xf32>
    %11 = vector.broadcast %10 : vector<48x1xf32> to vector<48x16xf32>
    %12 = arith.subf %6, %11 : vector<48x16xf32>
    %13 = arith.mulf %12, %12 : vector<48x16xf32>
    %cst_7 = arith.constant dense<0.000000e+00> : vector<48xf32>
    %14 = vector.multi_reduction <add>, %13, %cst_7 [1] : vector<48x16xf32> to vector<48xf32>
    %15 = vector.shape_cast %14 : vector<48xf32> to vector<48x1xf32>
    %cst_8 = arith.constant 1.600000e+01 : f32
    %16 = vector.broadcast %cst_8 : f32 to vector<48x1xf32>
    %17 = arith.divf %15, %16 : vector<48x1xf32>
    %18 = vector.broadcast %10 : vector<48x1xf32> to vector<48x16xf32>
    %19 = arith.subf %6, %18 : vector<48x16xf32>
    %cst_9 = arith.constant 9.99999974E-6 : f32
    %20 = vector.broadcast %cst_9 : f32 to vector<48x1xf32>
    %21 = arith.addf %17, %20 : vector<48x1xf32>
    %22 = math.rsqrt %21 : vector<48x1xf32>
    %23 = vector.broadcast %22 : vector<48x1xf32> to vector<48x16xf32>
    %24 = arith.mulf %19, %23 : vector<48x16xf32>
    %c0_10 = arith.constant 0 : index
    %c0_11 = arith.constant 0 : index
    %25 = vector.load %arg4[%c0_10, %c0_11] : memref<1x16xf32, #tpu.memory_space<vmem>>, vector<1x16xf32>
    %26 = vector.broadcast %25 : vector<1x16xf32> to vector<48x16xf32>
    %27 = arith.mulf %24, %26 : vector<48x16xf32>
    %c0_12 = arith.constant 0 : index
    %c0_13 = arith.constant 0 : index
    %28 = vector.load %arg5[%c0_12, %c0_13] : memref<1x16xf32, #tpu.memory_space<vmem>>, vector<1x16xf32>
    %29 = vector.broadcast %28 : vector<1x16xf32> to vector<48x16xf32>
    %30 = arith.addf %27, %29 : vector<48x16xf32>
    %cst_14 = arith.constant 0.000000e+00 : f32
    %31 = vector.broadcast %cst_14 : f32 to vector<48x16xf32>
    %32 = arith.maximumf %30, %31 : vector<48x16xf32>
    %c0_15 = arith.constant 0 : index
    %c0_16 = arith.constant 0 : index
    %33 = vector.load %arg6[%c0_15, %c0_16] : memref<48x16xf32, #tpu.memory_space<vmem>>, vector<48x16xf32>
    tpu.vector_store %arg6[%c0_15, %c0_16], %32 {strides = array<i32>} : memref<48x16xf32, #tpu.memory_space<vmem>>, vector<48x16xf32>,
    return
  }
  func.func @transform_0(%arg0: i32) -> (i32, i32) {
    %c0_i32 = arith.constant 0 : i32
    %c0_i32_0 = arith.constant 0 : i32
    return %arg0, %c0_i32 : i32, i32
  }
  func.func @transform_1(%arg0: i32) -> (i32, i32) {
    %c0_i32 = arith.constant 0 : i32
    %c0_i32_0 = arith.constant 0 : i32
    %c0_i32_1 = arith.constant 0 : i32
    return %c0_i32, %c0_i32_0 : i32, i32
  }
  func.func @transform_2(%arg0: i32) -> (i32, i32) {
    %c0_i32 = arith.constant 0 : i32
    %c0_i32_0 = arith.constant 0 : i32
    %c0_i32_1 = arith.constant 0 : i32
    return %c0_i32, %c0_i32_0 : i32, i32
  }
  func.func @transform_3(%arg0: i32) -> (i32, i32) {
    %c0_i32 = arith.constant 0 : i32
    %c0_i32_0 = arith.constant 0 : i32
    %c0_i32_1 = arith.constant 0 : i32
    return %c0_i32, %c0_i32_0 : i32, i32
  }
  func.func @transform_4(%arg0: i32) -> (i32, i32) {
    %c0_i32 = arith.constant 0 : i32
    %c0_i32_0 = arith.constant 0 : i32
    %c0_i32_1 = arith.constant 0 : i32
    return %c0_i32, %c0_i32_0 : i32, i32
  }
  func.func @transform_5(%arg0: i32) -> (i32, i32) {
    %c0_i32 = arith.constant 0 : i32
    %c0_i32_0 = arith.constant 0 : i32
    return %arg0, %c0_i32 : i32, i32
  }
}

</mosaic_0001>

<bundles_post_ra>
// kernel: tpu_custom_call.1
= control target key start
LH: loop header
LB: loop body
LE: loop exit
PB: predicated region body
PF: predicated region fallthrough
CT: control target
= control target key end

     0   :  { %s588_s18 = smov 0   ;;  %s652_s0 = inlined_call_operand.vmem [shape: f32[96,4], index: 0, kind: input, shape index: {}]   ;;  %s653_s1 = inlined_call_operand.vmem [shape: bf16[4,16], index: 1, kind: input, shape index: {}]   ;;  %s654_s2 = inlined_call_operand.vmem [shape: f32[1,16], index: 2, kind: input, shape index: {}]   ;;  %s655_s3 = inlined_call_operand.vmem [shape: f32[1,16], index: 3, kind: input, shape index: {}]   ;;  %s656_s4 = inlined_call_operand.vmem [shape: f32[1,16], index: 4, kind: input, shape index: {}]   ;;  %s657_s5 = inlined_call_operand.vmem [shape: f32[96,16], index: 5, kind: output, shape index: {}]  }
   0x1 LB: > { %s491_s19 = sadd.s32 4294967295, %s554_s18   ;;  %p495_p0 = scmp.ge.s32.totalorder %s554_s18, 1  ;;  %s554_s18 = sphi %s588_s18, %s15_s18  }
   0x2   : > { %p188_p1 = scmp.lt.s32.totalorder %s554_s18, 3 }
   0x4   : > { %p189_p2 = pnand %p495_p0, %p188_p1 }
   0x5   : > { %s216_s22 = smul.u32 (!%p189_p2), 6, %s491_s19 }
   0x6   : > { %192 = sbr.rel (%p189_p2) target bundleno = 536 (0x218), region = 40 }
   0x7   : > { %p217_p3 = scmp.lt.s32.totalorder (!%p189_p2), %s216_s22, 11 }
   0xb   : > { %v238_v0 = vld [vmem:[%s653_s1] sm:$0x3]  ;;  %vm256_vm0 = vcmask 1041408   ;;  %v556_v1 = vmov 0.0   ;;  %vm557_vm1 = vmmov 0   ;;  %s659_s22 = smov (!%p217_p3, %s216_s22), 11 }
   0xc   : > { %510 = vmatprep.subr.bf16.mxu0 %v556_v1  ;;  %524 = vmatprep.subr.bf16.mxu1 %v556_v1  ;;  %v258_v2 = vsel %vm256_vm0, %v238_v0, 0  ;;  %s496_s23 = sshll.u32 %s659_s22, 3  ;;  %vm246_vm2 = vcmask 31744   ;;  %v498_v12 = vld [vmem:[%s654_s2] ss:$0 sm:$0xff]  ;;  %vm317_vm3 = vcmask 130048  }
   0xd   : > { %511 = vmatpush3.bf16.msra.mxu0 %v258_v2  ;;  %525 = vmatpush3.bf16.msra.mxu1 %v258_v2  ;;  %s220_s26 = scalar_lea.vmem %s652_s0, %s496_s23  ;;  %s226_s10 = scalar_lea.vmem %s657_s5, %s496_s23 }
   0xe   : > { %512 = vmatprep.mubr.msk.bf16.mxu0 %vm557_vm1, %v556_v1  ;;  %516 = vmatprep.mubr.msk.bf16.mxu1 %vm557_vm1, %v556_v1  ;;  %v229_v3 = vld [vmem:[%s220_s26] sm:$0xff]  ;;  %v230_v4 = vld [vmem:[%s220_s26 + $0x8] sm:$0xff]  ;;  %v231_v5 = vld [vmem:[%s220_s26 + $0x10] sm:$0xff] }
   0xf   : > { %v235_v6 = vpack.c.bf16 %v230_v4, %v229_v3  ;;  %v232_v7 = vld [vmem:[%s220_s26 + $0x18] sm:$0xff]  ;;  %v233_v9 = vld [vmem:[%s220_s26 + $0x20] sm:$0xff]  ;;  %v234_v10 = vld [vmem:[%s220_s26 + $0x28] sm:$0xff] }
  0x10   : > { %v236_v8 = vpack.c.bf16 %v232_v7, %v231_v5  ;;  %v237_v11 = vpack.c.bf16 %v234_v10, %v233_v9 }
  0x11   : > { %513 = vmatmul.mubr.msk.bf16.vlgmr.msra.gmra.mxu0 %vm246_vm2, %v235_v6 }
  0x12   : > { %517 = vmatmul.mubr.msk.bf16.vlgmr.msra.gmra.mxu1 %vm246_vm2, %v236_v8 }
  0x13   : > { %520 = vmatprep.mubr.msk.bf16.mxu1 %vm557_vm1, %v556_v1 }
  0x1a   : > { %521 = vmatmul.mubr.msk.bf16.gmra.mxu1 %vm246_vm2, %v237_v11 }
  0xd1   : > { %v294_v13 = vpop.f32.mrf.mxu0 }
  0xd2   : > { %v295_v14 = vadd.f32 %v498_v12, %v294_v13  ;;  %v302_v15 = vpop.f32.mrf.mxu1 }
  0xd3   : > { %v303_v16 = vadd.f32 %v498_v12, %v302_v15  ;;  %v514_v17 = vpop.f32.mrf.mxu0 }
  0xd4   : > { %v518_v18 = vpop.f32.mrf.mxu1  ;;  %v318_v19 = vsel %vm317_vm3, %v295_v14, 0.0 }
  0xd5   : > { %v324_v20 = vsel %vm317_vm3, %v303_v16, 0.0  ;;  %319 = vadd.xlane.f32.xlu0 %v318_v19  ;;  %v297_v21 = vpop.f32.mrf.mxu0 }
  0xd6   : > { %325 = vadd.xlane.f32.xlu1 %v324_v20  ;;  %v305_v22 = vpop.f32.mrf.mxu1  ;;  %v298_v23 = vadd.f32 %v498_v12, %v297_v21 }
  0xd7   : > { %v306_v24 = vadd.f32 %v498_v12, %v305_v22  ;;  %v515_v25 = vpop.f32.mrf.mxu0  ;;  %v502_v22 = vld [vmem:[%s655_s3] ss:$0 sm:$0xff] }
  0xd8   : > { %v519_v26 = vpop.f32.mrf.mxu1  ;;  %v321_v27 = vsel %vm317_vm3, %v298_v23, 0.0 }
  0xd9   : > { %v327_v28 = vsel %vm317_vm3, %v306_v24, 0.0  ;;  %322 = vadd.xlane.f32.xlu0 %v321_v27 }
  0xda   : > { %328 = vadd.xlane.f32.xlu1 %v327_v28  ;;  %v310_v29 = vpop.f32.mrf.mxu1 }
  0xdb   : > { %v311_v30 = vadd.f32 %v498_v12, %v310_v29 }
  0xdc   : > { %v522_v31 = vpop.f32.mrf.mxu1 }
  0xdd   : > { %v330_v32 = vsel %vm317_vm3, %v311_v30, 0.0 }
  0xde   : > { %v313_v33 = vpop.f32.mrf.mxu1  ;;  %331 = vadd.xlane.f32.xlu0 %v330_v32 }
  0xdf   : > { %v314_v34 = vadd.f32 %v498_v12, %v313_v33 }
  0xe0   : > { %v523_v35 = vpop.f32.mrf.mxu1 }
  0xe1   : > { %v333_v36 = vsel %vm317_vm3, %v314_v34, 0.0 }
  0xe2   : > { %334 = vadd.xlane.f32.xlu1 %v333_v36 }
 0x15e   : > { %v320_v37 = vpop.xlane.xlu0 %319 }
 0x15f   : > { %v326_v38 = vpop.xlane.xlu1 %325  ;;  %v337_v39 = vmul.f32 0.0625, %v320_v37 }
 0x160   : > { %v339_v40 = vmul.f32 0.0625, %v326_v38 }
 0x161   : > { %v343_v41 = vsub.f32 %v295_v14, %v337_v39 }
 0x162   : > { %v616_v42 = vsub.f32 %v303_v16, %v339_v40  ;;  %v323_v43 = vpop.xlane.xlu0 %322 }
 0x163   : > { %v329_v44 = vpop.xlane.xlu1 %328  ;;  %v338_v45 = vmul.f32 0.0625, %v323_v43  ;;  %v349_v46 = vmul.f32 %v343_v41, %v343_v41 }
 0x164   : > { %v340_v47 = vmul.f32 0.0625, %v329_v44  ;;  %v351_v50 = vmul.f32 %v616_v42, %v616_v42 }
 0x165   : > { %v344_v48 = vsub.f32 %v298_v23, %v338_v45  ;;  %v355_v49 = vsel %vm317_vm3, %v349_v46, 0.0 }
 0x166   : > { %v621_v51 = vsub.f32 %v306_v24, %v340_v47  ;;  %356 = vadd.xlane.f32.xlu0 %v355_v49  ;;  %v361_v55 = vsel %vm317_vm3, %v351_v50, 0.0  ;;  %v503_v24 = vld [vmem:[%s656_s4] ss:$0 sm:$0xff] }
 0x167   : > { %v332_v52 = vpop.xlane.xlu0 %331  ;;  %v350_v53 = vmul.f32 %v344_v48, %v344_v48 }
 0x168   : > { %v341_v54 = vmul.f32 0.0625, %v332_v52  ;;  %v352_v57 = vmul.f32 %v621_v51, %v621_v51 }
 0x169   : > { %v358_v56 = vsel %vm317_vm3, %v350_v53, 0.0 }
 0x16a   : > { %v347_v58 = vsub.f32 %v311_v30, %v341_v54  ;;  %362 = vadd.xlane.f32.xlu0 %v361_v55  ;;  %359 = vadd.xlane.f32.xlu1 %v358_v56  ;;  %v364_v62 = vsel %vm317_vm3, %v352_v57, 0.0 }
 0x16b   : > { %v335_v59 = vpop.xlane.xlu1 %334 }
 0x16c   : > { %v342_v60 = vmul.f32 0.0625, %v335_v59  ;;  %v353_v61 = vmul.f32 %v347_v58, %v347_v58 }
 0x16e   : > { %v348_v63 = vsub.f32 %v314_v34, %v342_v60  ;;  %365 = vadd.xlane.f32.xlu1 %v364_v62  ;;  %v367_v0 = vsel %vm317_vm3, %v353_v61, 0.0 }
 0x16f   : > { %368 = vadd.xlane.f32.xlu0 %v367_v0 }
 0x170   : > { %v354_v1 = vmul.f32 %v348_v63, %v348_v63 }
 0x172   : > { %v370_v2 = vsel %vm317_vm3, %v354_v1, 0.0 }
 0x173   : > { %371 = vadd.xlane.f32.xlu1 %v370_v2 }
 0x1ef   : > { %v357_v3 = vpop.xlane.xlu0 %356 }
 0x1f0   : > { %v373_v4 = vmul.f32 0.0625, %v357_v3 }
 0x1f2   : > { %v379_v5 = vadd.f32 1e-05, %v373_v4 }
 0x1f3   : > { %v360_v6 = vpop.xlane.xlu1 %359  ;;  %v363_v7 = vpop.xlane.xlu0 %362 }
 0x1f4   : > { %536 = vrsqrt.f32 %v379_v5  ;;  %v374_v8 = vmul.f32 0.0625, %v360_v6  ;;  %v375_v9 = vmul.f32 0.0625, %v363_v7 }
 0x1f6   : > { %v380_v10 = vadd.f32 1e-05, %v374_v8  ;;  %v381_v11 = vadd.f32 1e-05, %v375_v9 }
 0x1f7   : > { %v366_v12 = vpop.xlane.xlu1 %365 }
 0x1f8   : > { %538 = vrsqrt.f32 %v380_v10  ;;  %v376_v13 = vmul.f32 0.0625, %v366_v12  ;;  %v369_v14 = vpop.xlane.xlu0 %368 }
 0x1f9   : > { %540 = vrsqrt.f32 %v381_v11  ;;  %v377_v15 = vmul.f32 0.0625, %v369_v14 }
 0x1fa   : > { %v382_v16 = vadd.f32 1e-05, %v376_v13 }
 0x1fb   : > { %v383_v17 = vadd.f32 1e-05, %v377_v15 }
 0x1fc   : > { %542 = vrsqrt.f32 %v382_v16  ;;  %v372_v18 = vpop.xlane.xlu1 %371 }
 0x1fd   : > { %544 = vrsqrt.f32 %v383_v17  ;;  %v378_v19 = vmul.f32 0.0625, %v372_v18 }
 0x1ff   : > { %v384_v20 = vadd.f32 1e-05, %v378_v19 }
 0x201   : > { %v537_v21 = vpop.eup %536  ;;  %546 = vrsqrt.f32 %v384_v20 }
 0x202   : > { %v391_v23 = vmul.f32 %v537_v21, %v343_v41 }
 0x204   : > { %v404_v25 = vmul.f32 %v502_v22, %v391_v23 }
 0x205   : > { %v539_v26 = vpop.eup %538 }
 0x206   : > { %v541_v27 = vpop.eup %540  ;;  %v417_v28 = vadd.f32 %v503_v24, %v404_v25  ;;  %v392_v29 = vmul.f32 %v539_v26, %v344_v48 }
 0x207   : > { %v393_v30 = vmul.f32 %v541_v27, %v616_v42 }
 0x208   : > { %v423_v31 = vmax.f32 %v417_v28, 0.0  ;;  %v405_v32 = vmul.f32 %v502_v22, %v392_v29 }
 0x209   : > { %v543_v33 = vpop.eup %542  ;;  %v406_v34 = vmul.f32 %v502_v22, %v393_v30 }
 0x20a   : > { %v545_v35 = vpop.eup %544  ;;  %429 = vst.msk [vmem:[%s226_s10] sm:$0xff] %vm317_vm3, %v423_v31  ;;  %v418_v36 = vadd.f32 %v503_v24, %v405_v32  ;;  %v394_v37 = vmul.f32 %v543_v33, %v621_v51 }
 0x20b   : > { %v419_v38 = vadd.f32 %v503_v24, %v406_v34  ;;  %v395_v39 = vmul.f32 %v545_v35, %v347_v58 }
 0x20c   : > { %v424_v40 = vmax.f32 %v418_v36, 0.0  ;;  %v407_v41 = vmul.f32 %v502_v22, %v394_v37 }
 0x20d   : > { %v425_v43 = vmax.f32 %v419_v38, 0.0  ;;  %v408_v44 = vmul.f32 %v502_v22, %v395_v39 }
 0x20e   : > { %v547_v45 = vpop.eup %546  ;;  %430 = vst.msk [vmem:[%s226_s10 + $0x8] sm:$0xff] %vm317_vm3, %v424_v40  ;;  %v420_v42 = vadd.f32 %v503_v24, %v407_v41 }
 0x20f   : > { %431 = vst.msk [vmem:[%s226_s10 + $0x10] sm:$0xff] %vm317_vm3, %v425_v43  ;;  %v421_v46 = vadd.f32 %v503_v24, %v408_v44  ;;  %v396_v47 = vmul.f32 %v547_v45, %v348_v63 }
 0x210   : > { %v426_v48 = vmax.f32 %v420_v42, 0.0 }
 0x211   : > { %v427_v49 = vmax.f32 %v421_v46, 0.0  ;;  %v409_v50 = vmul.f32 %v502_v22, %v396_v47 }
 0x212   : > { %432 = vst.msk [vmem:[%s226_s10 + $0x18] sm:$0xff] %vm317_vm3, %v426_v48 }
 0x213   : > { %433 = vst.msk [vmem:[%s226_s10 + $0x20] sm:$0xff] %vm317_vm3, %v427_v49  ;;  %v422_v51 = vadd.f32 %v503_v24, %v409_v50 }
 0x215   : > { %v428_v52 = vmax.f32 %v422_v51, 0.0 }
 0x217   : > { %434 = vst.msk [vmem:[%s226_s10 + $0x28] sm:$0xff] %vm317_vm3, %v428_v52 }
 0x218 PF: > { %s15_s18 = sadd.s32 1, %s554_s18  }
 0x219   : > { %p12_p4 = scmp.ge.s32.totalorder %s15_s18, 4  }
 0x21b   :  { %14 = sbr.rel (!%p12_p4) target bundleno = 1 (0x1), region = 70 }

</bundles_post_ra>
